<compile_context>
chip_gen: v7x
topology: tpu7x:2x2x1
jax: 0.10.0
libtpu: 0.0.40
codegen_flags: <defaults>
</compile_context>

<pallas_src>
import math

import jax
import jax.numpy as jnp
from jax.experimental import pallas as pl
from jax.experimental.pallas import tpu as pltpu


def _round_up(x, m):
    return ((x + m - 1) // m) * m


def _pick_divisor(n, prefs):
    for p in prefs:
        if p <= n and n % p == 0:
            return p
    return n


# ----------------------------------------------------------------------------
# Kernel 1: fused linear projection  y = x @ W + b, tiled over rows AND cols.
# ----------------------------------------------------------------------------
def _linear_kernel(x_ref, w_ref, b_ref, o_ref):
    o_ref[...] = (
        jnp.dot(x_ref[...], w_ref[...], preferred_element_type=jnp.float32)
        + b_ref[...]
    )


def linear_pallas(x, w, b, *, tile_m=512, tile_n=512):
    """y = x @ w + b.

    Returns the PADDED result [Mp, Ncols]: rows padded to a multiple of 8 (or
    the row tile), columns padded to a multiple of 128 (lane-dense unmasked
    stores).  MXU operands are cast to bf16; accumulation and the bias add stay
    in f32.  Callers slice out what they need (padded node rows are harmless:
    their attention weights are forced to 0 in-kernel).
    """
    M, K = x.shape
    Kw, Nout = w.shape
    assert K == Kw

    w = w.astype(jnp.float32)
    b = b.astype(jnp.float32)
    Ncols = _round_up(Nout, 128)
    if Ncols != Nout:
        w = jnp.pad(w, ((0, 0), (0, Ncols - Nout)))
        b = jnp.pad(b, (0, Ncols - Nout))
    b2 = b.reshape(1, Ncols)

    x = x.astype(jnp.float32)
    Mp = _round_up(M, 8)
    if Mp != M:
        x = jnp.pad(x, ((0, Mp - M), (0, 0)))

    tm = _pick_divisor(Mp, (tile_m, 512, 256, 128, 64, 32, 16, 8))
    tn = _pick_divisor(Ncols, (tile_n, 512, 256, 128))

    # bf16 MXU operands (native bf16 MXU rate, half the DMA bytes); f32 accum.
    x_b = x.astype(jnp.bfloat16)
    w_b = w.astype(jnp.bfloat16)

    return pl.pallas_call(
        _linear_kernel,
        out_shape=jax.ShapeDtypeStruct((Mp, Ncols), jnp.float32),
        grid=(Mp // tm, Ncols // tn),
        in_specs=[
            pl.BlockSpec((tm, K), lambda i, j: (i, 0)),
            pl.BlockSpec((K, tn), lambda i, j: (0, j)),   # W is column-tiled now
            pl.BlockSpec((1, tn), lambda i, j: (0, j)),
        ],
        out_specs=pl.BlockSpec((tm, tn), lambda i, j: (i, j)),
        compiler_params=pltpu.CompilerParams(
            dimension_semantics=("parallel", "parallel")),
    )(x_b, w_b, b2)


# ----------------------------------------------------------------------------
# Kernel 2: per-(head, query-tile) attention.
#   K2sT   : [H, D, Np]   bf16  K2 * b_E2 / sqrt(D)  (pre-folded into W_K2),
#                               lane-dense in N, contraction over sublanes
#   Q2t    : [H, D, Np]   bf16
#   Vaug   : [H, D+1, Np] f32   [V^T ; ones]  (ones row fuses z = sum_i w)
#   w_real : [H, Np, Np]  f32   exp(clip(real score))/(g+1) at real edges,
#                               0 elsewhere and on the diagonal / padding
# Output   : [H, D, Np]   f32   (lane-dense in N; transposed outside)
#
# The fake path (gamma/(gamma+1) * exp(clip(fake score))) is reconstructed
# in-kernel: `w_real == 0` marks non-edge positions (exp(clip(.)) > 0 always);
# the diagonal and the rows/cols >= n_real (padding) are masked via iota.
# ----------------------------------------------------------------------------
def graph_mha_attention(K2sT, Q2t, Vaug, w_real, *, gamma, n_real, tile_j=256):
    H, D, Np = K2sT.shape
    Dp1 = Vaug.shape[1]
    # Np is a multiple of 128, so TJ is always a lane-dense 128/256 tile.
    # TODO(synk): allow TJ=512 on 128-MiB-VMEM chips (v5e/v6e) for large N.
    TJ = _pick_divisor(Np, (tile_j, 256, 128))
    fake_c = float(gamma) / (float(gamma) + 1.0)

    def kernel(k2s_ref, q2t_ref, vaug_ref, wr_ref, o_ref):
        j0 = pl.program_id(1) * TJ
        # fake score via MXU, contracting the sublane (D) axis of both operands
        # -> both operands stay lane-dense in N even for small D.
        s = jax.lax.dot_general(
            k2s_ref[0], q2t_ref[0],
            dimension_numbers=(((0,), (0,)), ((), ())),
            preferred_element_type=jnp.float32)                    # [Np, TJ]
        wr = wr_ref[0]                                             # [Np, TJ]
        row = jax.lax.broadcasted_iota(jnp.int32, (Np, TJ), 0)
        col = jax.lax.broadcasted_iota(jnp.int32, (Np, TJ), 1) + j0
        # exp(clip(., -5, 5)) > 0 always => wr == 0 exactly marks non-edges.
        is_fake = (wr == 0.0) & (row != col) & (row < n_real) & (col < n_real)
        fscale = jnp.where(is_fake, fake_c, 0.0)
        # single exp, single select, folded into one multiply-add
        w = fscale * jnp.exp(jnp.clip(s, -5.0, 5.0)) + wr          # [Np, TJ]
        # aggregation + row-sum z in one matmul: [D+1, TJ]
        agg = jnp.dot(vaug_ref[0], w, preferred_element_type=jnp.float32)
        out = agg[:-1, :]                                          # [D, TJ]
        z = agg[-1:, :]                                            # [1, TJ]
        o_ref[0] = out * pl.reciprocal(z + 1e-6, approx=True)

    # TODO(synk): for very large N on v7x (64 MiB VMEM) drop tile_j to 128 or
    # raise vmem_limit_bytes; with fake_scale removed TJ=256 fits the default
    # scoped limit for N up to ~8K.  Optionally pl.Buffered(3) on w_real.
    return pl.pallas_call(
        kernel,
        out_shape=jax.ShapeDtypeStruct((H, D, Np), jnp.float32),
        grid=(H, Np // TJ),
        in_specs=[
            pl.BlockSpec((1, D, Np), lambda h, j: (h, 0, 0)),     # K2sT (const over j)
            pl.BlockSpec((1, D, TJ), lambda h, j: (h, 0, j)),     # Q2t
            pl.BlockSpec((1, Dp1, Np), lambda h, j: (h, 0, 0)),   # Vaug (const over j)
            pl.BlockSpec((1, Np, TJ), lambda h, j: (h, 0, j)),    # w_real
        ],
        out_specs=pl.BlockSpec((1, D, TJ), lambda h, j: (h, 0, j)),
        compiler_params=pltpu.CompilerParams(
            dimension_semantics=("parallel", "parallel")),
    )(K2sT, Q2t, Vaug, w_real)


# ----------------------------------------------------------------------------
# Full forward (sparse edge path + small reshapes in plain JAX, hot dense path
# in Pallas).
# ----------------------------------------------------------------------------
def multi_head_attention_forward(h, e, src, dst, params, *, gamma, num_heads,
                                 out_dim, num_nodes):
    N, H, D = num_nodes, num_heads, out_dim
    HD = H * D
    f32 = jnp.float32
    gamma = float(gamma)
    inv_sqrt_d = 1.0 / math.sqrt(float(D))

    Np = _round_up(N, 128)          # lane-dense node count for the attention kernel

    # ---- fold b_E2 * 1/sqrt(D) into the K2 projection (one-time weight prep)
    e2_scale = params["b_E2"].astype(f32) * inv_sqrt_d               # [HD]
    W_K2s = params["W_K2"].astype(f32) * e2_scale[None, :]
    b_K2s = params["b_K2"].astype(f32) * e2_scale

    # ---- fused node projections [Q | K | Q2 | K2s | V] : one wide MXU matmul
    W_all = jnp.concatenate(
        [params["W_Q"], params["W_K"], params["W_Q2"], W_K2s, params["W_V"]],
        axis=1)
    b_all = jnp.concatenate(
        [params["b_Q"], params["b_K"], params["b_Q2"], b_K2s, params["b_V"]])

    h_p = jnp.pad(h.astype(f32), ((0, Np - N), (0, 0)))
    proj = linear_pallas(h_p, W_all, b_all)                           # [Np, >=5HD] f32

    Qh_flat = proj[:, 0 * HD:1 * HD]
    Kh_flat = proj[:, 1 * HD:2 * HD]

    # ---- real-edge path: only O(E*H*D) work on the edge list
    # TODO(synk): per-edge gather + dense [H,N,N] scatter stay in XLA; a CSR
    # scatter into the VMEM tile via PrefetchScalarGridSpec would remove the
    # O(H*N^2) w_real stream entirely (bigger redesign).
    E_full = linear_pallas(e.astype(f32), params["W_E"], params["b_E"])
    E_edge = E_full[:e.shape[0], :HD].reshape(-1, H, D)
    Ke = Kh_flat[src].reshape(-1, H, D)
    Qe = Qh_flat[dst].reshape(-1, H, D)
    score_real = jnp.einsum("ehd,ehd->eh", Ke * E_edge, Qe) * inv_sqrt_d
    w_real_e = jnp.exp(jnp.clip(score_real, -5.0, 5.0)) / (gamma + 1.0)  # [E, H] > 0
    w_real = jnp.zeros((H, Np, Np), f32).at[:, src, dst].set(w_real_e.T)
    diag = jnp.arange(N)
    w_real = w_real.at[:, diag, diag].set(0.0)        # no self-attention (kept f32)

    # ---- head-major, lane-dense-in-N layouts for the attention kernel
    # (bf16 only on the score operands; V / w_real stay f32 for accuracy)
    Q2t = proj[:, 2 * HD:3 * HD].reshape(Np, H, D).transpose(1, 2, 0)
    K2sT = proj[:, 3 * HD:4 * HD].reshape(Np, H, D).transpose(1, 2, 0)
    Vt = proj[:, 4 * HD:5 * HD].reshape(Np, H, D).transpose(1, 2, 0)   # [H, D, Np]
    Vaug = jnp.concatenate([Vt, jnp.ones((H, 1, Np), f32)], axis=1)    # [H, D+1, Np]

    out_hdn = graph_mha_attention(
        K2sT.astype(jnp.bfloat16), Q2t.astype(jnp.bfloat16), Vaug, w_real,
        gamma=gamma, n_real=N)                                          # [H, D, Np]

    # module contract: return [N, H, D]
    # TODO(synk): drop this transpose if downstream can consume [H, D, N].
    return out_hdn[:, :, :N].transpose(2, 0, 1)


# ----------------------------------------------------------------------------
# pure-JAX reference (mirrors the PyTorch dense forward exactly)
# ----------------------------------------------------------------------------
def reference_forward(h, e, src, dst, params, *, gamma, num_heads, out_dim,
                      num_nodes):
    N, H, D = num_nodes, num_heads, out_dim
    in_dim = h.shape[-1]
    adj = jnp.zeros((N, N, in_dim), jnp.float32).at[src, dst].set(e)

    lin = lambda x, W, b: x @ W + b
    Qh = lin(h, params["W_Q"], params["b_Q"]).reshape(N, H, D)
    Kh = lin(h, params["W_K"], params["b_K"]).reshape(N, H, D)
    Q2h = lin(h, params["W_Q2"], params["b_Q2"]).reshape(N, H, D)
    K2h = lin(h, params["W_K2"], params["b_K2"]).reshape(N, H, D)
    Vh = lin(h, params["W_V"], params["b_V"]).reshape(N, H, D)
    Er = lin(adj, params["W_E"], params["b_E"]).reshape(N, N, H, D)
    Ef = lin(adj, params["W_E2"], params["b_E2"]).reshape(N, N, H, D)

    wr = jnp.einsum("ihd,jhd,ijhd->ijh", Kh, Qh, Er) / math.sqrt(D)
    wf = jnp.einsum("ihd,jhd,ijhd->ijh", K2h, Q2h, Ef) / math.sqrt(D)
    wr_e = jnp.exp(jnp.clip(wr, -5, 5)) / (gamma + 1)
    wf_e = gamma * jnp.exp(jnp.clip(wf, -5, 5)) / (gamma + 1)
    w = wf_e.at[src, dst].set(wr_e[src, dst])
    vr = jnp.arange(N)
    w = w.at[vr, vr].set(0.0)
    out = jnp.einsum("ijh,ihd->jhd", w, Vh)
    z = jnp.sum(w, axis=0).reshape(N, H, 1)
    return out / (z + 1e-6)


if __name__ == "__main__":
    # small, deterministic configuration
    N, in_dim, out_dim, num_heads = 8, 16, 8, 4
    gamma = 1.0

    key = jax.random.PRNGKey(0)
    keys = jax.random.split(key, 20)

    h = jax.random.normal(keys[0], (N, in_dim), jnp.float32)

    # deterministic real edge set (two outgoing edges per node, no self loops)
    src = jnp.concatenate([jnp.arange(N), jnp.arange(N)])
    dst = jnp.concatenate([(jnp.arange(N) + 1) % N, (jnp.arange(N) + 3) % N])
    num_edges = src.shape[0]
    e = jax.random.normal(keys[1], (num_edges, in_dim), jnp.float32)

    HD = out_dim * num_heads
    names = ["Q", "K", "E", "Q2", "K2", "E2", "V"]
    params = {}
    for i, n in enumerate(names):
        params[f"W_{n}"] = 0.1 * jax.random.normal(
            keys[2 + 2 * i], (in_dim, HD), jnp.float32)
        params[f"b_{n}"] = 0.1 * jax.random.normal(
            keys[3 + 2 * i], (HD,), jnp.float32)

    h_out = multi_head_attention_forward(
        h, e, src, dst, params,
        gamma=gamma, num_heads=num_heads, out_dim=out_dim, num_nodes=N)
    h_out = jax.block_until_ready(h_out)

    ref = reference_forward(
        h, e, src, dst, params,
        gamma=gamma, num_heads=num_heads, out_dim=out_dim, num_nodes=N)
    ref = jax.block_until_ready(ref)

    assert h_out.shape == (N, num_heads, out_dim)
    # tolerance budget: bf16 MXU operands (~0.4% rel) + EUP approx reciprocal
    assert jnp.allclose(h_out, ref, rtol=5e-3, atol=5e-3), (
        "Pallas output does not match reference")
    print("KERNEL_OK")
</pallas_src>

<mosaic_0001>
module attributes {stable_mosaic.version = 11 : i64} {
  func.func @_linear_kernel(%arg0: i32, %arg1: i32, %arg2: memref<128x16xbf16, #tpu.memory_space<vmem>>, %arg3: memref<16x256xbf16, #tpu.memory_space<vmem>>, %arg4: memref<1x256xf32, #tpu.memory_space<vmem>>, %arg5: memref<128x256xf32, #tpu.memory_space<vmem>>) attributes {dimension_semantics = [#tpu.dimension_semantics<parallel>, #tpu.dimension_semantics<parallel>], iteration_bounds = array<i64: 1, 1>, scalar_prefetch = 0 : i64, scratch_operands = 0 : i64, tpu.core_type = #tpu.core_type<tc>, window_params = [{transform_indices = @transform_0, window_bounds = array<i64: 128, 16>}, {transform_indices = @transform_1, window_bounds = array<i64: 16, 256>}, {transform_indices = @transform_2, window_bounds = array<i64: 1, 256>}, {transform_indices = @transform_3, window_bounds = array<i64: 128, 256>}]} {
    %c0 = arith.constant 0 : index
    %c0_0 = arith.constant 0 : index
    %0 = vector.load %arg2[%c0, %c0_0] : memref<128x16xbf16, #tpu.memory_space<vmem>>, vector<128x16xbf16>
    %c0_1 = arith.constant 0 : index
    %c0_2 = arith.constant 0 : index
    %1 = vector.load %arg3[%c0_1, %c0_2] : memref<16x256xbf16, #tpu.memory_space<vmem>>, vector<16x256xbf16>
    %cst = arith.constant dense<0.000000e+00> : vector<128x256xf32>
    %2 = tpu.matmul %0, %1, %cst {dimension_numbers = #tpu.dot_dimension_numbers<[1], [0], [0], [1], [0, 0, 1, 1], [], []>} : vector<128x16xbf16>, vector<16x256xbf16>, vector<128x256xf32> -> vector<128x256xf32>
    %c0_3 = arith.constant 0 : index
    %c0_4 = arith.constant 0 : index
    %3 = vector.load %arg4[%c0_3, %c0_4] : memref<1x256xf32, #tpu.memory_space<vmem>>, vector<1x256xf32>
    %4 = vector.broadcast %3 : vector<1x256xf32> to vector<128x256xf32>
    %5 = arith.addf %2, %4 : vector<128x256xf32>
    %c0_5 = arith.constant 0 : index
    %c0_6 = arith.constant 0 : index
    %6 = vector.load %arg5[%c0_5, %c0_6] : memref<128x256xf32, #tpu.memory_space<vmem>>, vector<128x256xf32>
    tpu.vector_store %arg5[%c0_5, %c0_6], %5 {strides = array<i32>} : memref<128x256xf32, #tpu.memory_space<vmem>>, vector<128x256xf32>,
    return
  }
  func.func @transform_0(%arg0: i32, %arg1: i32) -> (i32, i32) {
    %c0_i32 = arith.constant 0 : i32
    %c0_i32_0 = arith.constant 0 : i32
    return %arg0, %c0_i32 : i32, i32
  }
  func.func @transform_1(%arg0: i32, %arg1: i32) -> (i32, i32) {
    %c0_i32 = arith.constant 0 : i32
    %c0_i32_0 = arith.constant 0 : i32
    return %c0_i32, %arg1 : i32, i32
  }
  func.func @transform_2(%arg0: i32, %arg1: i32) -> (i32, i32) {
    %c0_i32 = arith.constant 0 : i32
    %c0_i32_0 = arith.constant 0 : i32
    return %c0_i32, %arg1 : i32, i32
  }
  func.func @transform_3(%arg0: i32, %arg1: i32) -> (i32, i32) {
    %c0_i32 = arith.constant 0 : i32
    return %arg0, %arg1 : i32, i32
  }
}

</mosaic_0001>

<bundles_post_ra>
// kernel: tpu_custom_call.1
= control target key start
LH: loop header
LB: loop body
LE: loop exit
PB: predicated region body
PF: predicated region fallthrough
CT: control target
= control target key end

     0   :  { %v341_v2 = vmov 0   ;;  %vm96_vm0 = vcmask 130048   ;;  %s454_s0 = inlined_call_operand.vmem [shape: bf16[128,16], index: 0, kind: input, shape index: {}]   ;;  %s455_s1 = inlined_call_operand.vmem [shape: bf16[16,256], index: 1, kind: input, shape index: {}]   ;;  %s456_s2 = inlined_call_operand.vmem [shape: f32[1,256], index: 2, kind: input, shape index: {}]   ;;  %s457_s3 = inlined_call_operand.hbm [shape: f32[128,256], index: 3, kind: output, shape index: {}]  }
   0x1   :  { %v306_v0 = vld [vmem:[%s455_s1 + $0x4] ss:$8 sps:$4 sm:$0xff]   ;;  %v308_v1 = vld [vmem:[%s455_s1] ss:$8 sps:$4 sm:$0xff]   ;;  %153 = vmatprep.mubr.bf16.mxu0 %v341_v2  ;;  %193 = vmatprep.mubr.bf16.mxu1 %v341_v2 }
   0x2   :  { %121 = vmatprep.subr.bf16.mxu0 %v306_v0  ;;  %300 = vmatprep.subr.bf16.mxu1 %v306_v0  ;;  %v309_v3 = vld [vmem:[%s454_s0] sm:$0xff]  }
   0x3   :  { %122 = vmatpush1.bf16.msra.mxu0 %v308_v1  ;;  %301 = vmatpush1.bf16.msra.mxu1 %v308_v1  ;;  %v310_v4 = vld [vmem:[%s454_s0 + $0x20] sm:$0xff]  }
   0x6   :  { %292 = vmatmul.mubr.msk.bf16.vlgmr.msra.gmra.mrb[0].mxu0 %vm96_vm0, %v309_v3  ;;  %296 = vmatmul.mubr.msk.bf16.vlgmr.msra.gmra.mrb[0].mxu1 %vm96_vm0, %v310_v4 }
   0x7   :  { %163 = vmatprep.mubr.bf16.mxu0 %v341_v2  ;;  %203 = vmatprep.mubr.bf16.mxu1 %v341_v2 }
   0x8   :  { %8 = vsyncpa [#allocation3], 0  ;;  %v311_v5 = vld [vmem:[%s454_s0 + $0x8] sm:$0xff]   ;;  %v313_v7 = vld [vmem:[%s454_s0 + $0x10] sm:$0xff]   ;;  %v36_v11 = vlaneseq }
   0x9   :  { %v312_v6 = vld [vmem:[%s454_s0 + $0x28] sm:$0xff]   ;;  %v314_v8 = vld [vmem:[%s454_s0 + $0x30] sm:$0xff]   ;;  %v315_v9 = vld [vmem:[%s454_s0 + $0x18] sm:$0xff]  }
   0xa   :  { %v316_v10 = vld [vmem:[%s454_s0 + $0x38] sm:$0xff]   ;;  %v37_v12 = vshrl.u32 %v36_v11, 7  ;;  %v34_v14 = vld [vmem:[%s456_s2] sm:$0x3]  ;;  %s342_s0 = smov [#allocation2]  }
   0xb   :  { %s271_s2 = sshll.u32 %s342_s0, 4  ;;  %s272_s2 = int_to_ptr.vmem [resolvable:$true] %s271_s2 }
   0xc   :  { %v38_v13 = vsub.s32 0, %v37_v12  ;;  %v42_v15 = vsub.s32 1, %v37_v12  ;;  %s317_s6 = scalar_lea.vmem %s272_s2, 4096  ;;  %p322_p1 = scmp.lt.s32.totalorder %s272_s2, %s272_s2 }
   0xd   :  { %p318_p0 = scmp.ne.s32.totalorder %s272_s2, %s317_s6  ;;  %p323_p2 = scmp.lt.s32.totalorder %s317_s6, %s317_s6 }
   0xe   :  { %293 = vmatmul.mubr.msk.bf16.gmra.mrb[4].mxu0 %vm96_vm0, %v311_v5  ;;  %297 = vmatmul.mubr.msk.bf16.gmra.mrb[4].mxu1 %vm96_vm0, %v312_v6  ;;  %v406_v16 = vrot.slane %v34_v14, %v38_v13  ;;  %v408_v17 = vrot.slane %v34_v14, %v42_v15 }
   0xf   :  { %173 = vmatprep.mubr.bf16.mxu0 %v341_v2  ;;  %213 = vmatprep.mubr.bf16.mxu1 %v341_v2  ;;  %p324_p3 = por %p323_p2, %p322_p1 }
  0x11   :  { %p325_p4 = pnand %p324_p3, %p318_p0 }
  0x16   :  { %294 = vmatmul.mubr.msk.bf16.gmra.mrb[8].mxu0 %vm96_vm0, %v313_v7  ;;  %298 = vmatmul.mubr.msk.bf16.gmra.mrb[8].mxu1 %vm96_vm0, %v314_v8 }
  0x17   :  { %183 = vmatprep.mubr.bf16.mxu0 %v341_v2  ;;  %223 = vmatprep.mubr.bf16.mxu1 %v341_v2 }
  0x1e   :  { %295 = vmatmul.mubr.msk.bf16.gmra.mrb[12].mxu0 %vm96_vm0, %v315_v9  ;;  %299 = vmatmul.mubr.msk.bf16.gmra.mrb[12].mxu1 %vm96_vm0, %v316_v10 }
  0xd9   :  { %v155_v18 = vpop.f32.mrb[0].mxu0  ;;  %v195_v19 = vpop.f32.mrb[0].mxu1 }
  0xda   :  { %v156_v20 = vadd.f32 %v155_v18, %v406_v16  ;;  %v196_v21 = vadd.f32 %v195_v19, %v406_v16  ;;  %v157_v22 = vpop.f32.mrb[1].mxu0  ;;  %v197_v23 = vpop.f32.mrb[1].mxu1 }
  0xdb   :  { %v158_v24 = vadd.f32 %v157_v22, %v408_v17  ;;  %v198_v25 = vadd.f32 %v197_v23, %v408_v17  ;;  %v159_v26 = vpop.f32.mrb[2].mxu0  ;;  %v199_v27 = vpop.f32.mrb[2].mxu1 }
  0xdc   :  { %234 = vst [vmem:[#allocation2] sm:$0xff] %v156_v20  ;;  %250 = vst [vmem:[#allocation2 + $0x80] sm:$0xff] %v196_v21  ;;  %v160_v28 = vadd.f32 %v159_v26, %v406_v16  ;;  %v200_v29 = vadd.f32 %v199_v27, %v406_v16  ;;  %v161_v30 = vpop.f32.mrb[3].mxu0  ;;  %v201_v31 = vpop.f32.mrb[3].mxu1 }
  0xdd   :  { %235 = vst [vmem:[#allocation2 + $0x8] sm:$0xff] %v158_v24  ;;  %251 = vst [vmem:[#allocation2 + $0x88] sm:$0xff] %v198_v25  ;;  %v162_v32 = vadd.f32 %v161_v30, %v408_v17  ;;  %v202_v33 = vadd.f32 %v201_v31, %v408_v17 }
  0xde   :  { %236 = vst [vmem:[#allocation2 + $0x10] sm:$0xff] %v160_v28  ;;  %252 = vst [vmem:[#allocation2 + $0x90] sm:$0xff] %v200_v29 }
  0xdf   :  { %237 = vst [vmem:[#allocation2 + $0x18] sm:$0xff] %v162_v32  ;;  %253 = vst [vmem:[#allocation2 + $0x98] sm:$0xff] %v202_v33 }
  0xe1   :  { %v165_v34 = vpop.f32.mrb[4].mxu0  ;;  %v205_v35 = vpop.f32.mrb[4].mxu1 }
  0xe2   :  { %v166_v36 = vadd.f32 %v165_v34, %v406_v16  ;;  %v206_v37 = vadd.f32 %v205_v35, %v406_v16  ;;  %v167_v38 = vpop.f32.mrb[5].mxu0  ;;  %v207_v39 = vpop.f32.mrb[5].mxu1 }
  0xe3   :  { %v168_v40 = vadd.f32 %v167_v38, %v408_v17  ;;  %v208_v41 = vadd.f32 %v207_v39, %v408_v17  ;;  %v169_v42 = vpop.f32.mrb[6].mxu0  ;;  %v209_v43 = vpop.f32.mrb[6].mxu1 }
  0xe4   :  { %238 = vst [vmem:[#allocation2 + $0x20] sm:$0xff] %v166_v36  ;;  %254 = vst [vmem:[#allocation2 + $0xa0] sm:$0xff] %v206_v37  ;;  %v170_v44 = vadd.f32 %v169_v42, %v406_v16  ;;  %v210_v45 = vadd.f32 %v209_v43, %v406_v16  ;;  %v171_v46 = vpop.f32.mrb[7].mxu0  ;;  %v211_v47 = vpop.f32.mrb[7].mxu1 }
  0xe5   :  { %239 = vst [vmem:[#allocation2 + $0x28] sm:$0xff] %v168_v40  ;;  %255 = vst [vmem:[#allocation2 + $0xa8] sm:$0xff] %v208_v41  ;;  %v172_v48 = vadd.f32 %v171_v46, %v408_v17  ;;  %v212_v49 = vadd.f32 %v211_v47, %v408_v17 }
  0xe6   :  { %240 = vst [vmem:[#allocation2 + $0x30] sm:$0xff] %v170_v44  ;;  %256 = vst [vmem:[#allocation2 + $0xb0] sm:$0xff] %v210_v45 }
  0xe7   :  { %241 = vst [vmem:[#allocation2 + $0x38] sm:$0xff] %v172_v48  ;;  %257 = vst [vmem:[#allocation2 + $0xb8] sm:$0xff] %v212_v49 }
  0xe9   :  { %v175_v50 = vpop.f32.mrb[8].mxu0  ;;  %v215_v51 = vpop.f32.mrb[8].mxu1 }
  0xea   :  { %v176_v52 = vadd.f32 %v175_v50, %v406_v16  ;;  %v216_v53 = vadd.f32 %v215_v51, %v406_v16  ;;  %v177_v54 = vpop.f32.mrb[9].mxu0  ;;  %v217_v55 = vpop.f32.mrb[9].mxu1 }
  0xeb   :  { %v178_v56 = vadd.f32 %v177_v54, %v408_v17  ;;  %v218_v57 = vadd.f32 %v217_v55, %v408_v17  ;;  %v179_v58 = vpop.f32.mrb[10].mxu0  ;;  %v219_v59 = vpop.f32.mrb[10].mxu1 }
  0xec   :  { %242 = vst [vmem:[#allocation2 + $0x40] sm:$0xff] %v176_v52  ;;  %258 = vst [vmem:[#allocation2 + $0xc0] sm:$0xff] %v216_v53  ;;  %v180_v60 = vadd.f32 %v179_v58, %v406_v16  ;;  %v220_v61 = vadd.f32 %v219_v59, %v406_v16  ;;  %v181_v62 = vpop.f32.mrb[11].mxu0  ;;  %v221_v63 = vpop.f32.mrb[11].mxu1 }
  0xed   :  { %243 = vst [vmem:[#allocation2 + $0x48] sm:$0xff] %v178_v56  ;;  %259 = vst [vmem:[#allocation2 + $0xc8] sm:$0xff] %v218_v57  ;;  %v182_v0 = vadd.f32 %v181_v62, %v408_v17  ;;  %v222_v1 = vadd.f32 %v221_v63, %v408_v17 }
  0xee   :  { %244 = vst [vmem:[#allocation2 + $0x50] sm:$0xff] %v180_v60  ;;  %260 = vst [vmem:[#allocation2 + $0xd0] sm:$0xff] %v220_v61 }
  0xef   :  { %245 = vst [vmem:[#allocation2 + $0x58] sm:$0xff] %v182_v0  ;;  %261 = vst [vmem:[#allocation2 + $0xd8] sm:$0xff] %v222_v1 }
  0xf1   :  { %v185_v2 = vpop.f32.mrb[12].mxu0  ;;  %v225_v3 = vpop.f32.mrb[12].mxu1 }
  0xf2   :  { %v186_v4 = vadd.f32 %v185_v2, %v406_v16  ;;  %v226_v5 = vadd.f32 %v225_v3, %v406_v16  ;;  %v187_v6 = vpop.f32.mrb[13].mxu0  ;;  %v227_v7 = vpop.f32.mrb[13].mxu1 }
  0xf3   :  { %v188_v8 = vadd.f32 %v187_v6, %v408_v17  ;;  %v228_v9 = vadd.f32 %v227_v7, %v408_v17  ;;  %v189_v10 = vpop.f32.mrb[14].mxu0  ;;  %v229_v11 = vpop.f32.mrb[14].mxu1 }
  0xf4   :  { %246 = vst [vmem:[#allocation2 + $0x60] sm:$0xff] %v186_v4  ;;  %262 = vst [vmem:[#allocation2 + $0xe0] sm:$0xff] %v226_v5  ;;  %v190_v12 = vadd.f32 %v189_v10, %v406_v16  ;;  %v230_v13 = vadd.f32 %v229_v11, %v406_v16  ;;  %v191_v14 = vpop.f32.mrb[15].mxu0  ;;  %v231_v15 = vpop.f32.mrb[15].mxu1 }
  0xf5   :  { %247 = vst [vmem:[#allocation2 + $0x68] sm:$0xff] %v188_v8  ;;  %263 = vst [vmem:[#allocation2 + $0xe8] sm:$0xff] %v228_v9  ;;  %v192_v18 = vadd.f32 %v191_v14, %v408_v17  ;;  %v232_v19 = vadd.f32 %v231_v15, %v408_v17 }
  0xf6   :  { %248 = vst [vmem:[#allocation2 + $0x70] sm:$0xff] %v190_v12  ;;  %264 = vst [vmem:[#allocation2 + $0xf0] sm:$0xff] %v230_v13 }
  0xf7   :  { %249 = vst [vmem:[#allocation2 + $0x78] sm:$0xff] %v192_v18  ;;  %265 = vst [vmem:[#allocation2 + $0xf8] sm:$0xff] %v232_v19 }
  0xf8   :  { %328 = shalt.err (!%p325_p4)
}
  0xf9   :  { %s329_s9 = scalar_lea.hbm %s457_s3, 4096 }
  0xfa   :  { %p330_p5 = scmp.ne.s32.totalorder %s457_s3, %s329_s9  ;;  %p333_p6 = scmp.lt.u32.totalorder %s329_s9, %s457_s3 }
  0xfc   :  { %p335_p7 = pnand %p333_p6, %p330_p5 }
  0xfe   :  { %338 = shalt.err (!%p335_p7)
}
  0xff   :  { %s343_s14 = smov 256   ;;  %s344_s15 = smov 16  }
 0x100   :  { %277 = dma.vmem_to_hbm [thread:$0]  %s272_s2, 4096, %s457_s3, [#allocation3], %s343_s14, %s343_s14, %s344_s15  }
 0x101   :  { %339 = dma.done.wait [#allocation3], 4096  }
 0x102   :  { %340 = vsyncadd [#allocation3], 4294963200 }
 0x103   :  { %281 = vsyncpa [#allocation3], 1 }

</bundles_post_ra>
